<compile_context>
chip_gen: v7x
topology: tpu7x:2x2x1
jax: 0.10.0
libtpu: 0.0.40
codegen_flags: <defaults>
</compile_context>

<pallas_src>
import functools

import jax
import jax.numpy as jnp
from jax.experimental import pallas as pl
from jax.experimental.pallas import tpu as pltpu


def _round_up(x, mult):
    return (x + mult - 1) // mult * mult


# ----------------------------- Pallas kernel --------------------------------

def _fused_conv_kernel(w_ref, b_ref, x_ref, o_ref, *, k, wp):
    """Fused im2col + GEMM + bias for one batch element.

    w_ref: (k*k, Cout_pad, Cin) f32   per-tap fused weights (W_s @ U, re-laid out)
    b_ref: (Cout_pad, 1)        f32   conv bias
    x_ref: (Cin, P)             bf16  zero-padded input, rows flattened, stride wp
    o_ref: (Cout_pad, TL)       f32   output, rows flattened with stride wp
    """
    tl = o_ref.shape[-1]
    # One aligned load of the padded row, widened once to f32.  The k*k taps
    # below are static lane-offset slices of this value -- the im2col, fused,
    # with zero extra HBM traffic.
    # TODO(synk): for large Cin*P slice x_ref per tap / tile Cin instead of
    # keeping the whole row live.
    xrow = x_ref[...].astype(jnp.float32)                       # (Cin, P)
    acc = jnp.zeros(o_ref.shape, jnp.float32)
    for kh in range(k):                                         # k*k taps, unrolled
        for kw in range(k):
            off = kh * wp + kw                                  # static lane offset
            xs = xrow[:, off:off + tl]                          # (Cin, TL) shifted window
            acc = acc + jnp.dot(w_ref[kh * k + kw], xs,
                                preferred_element_type=jnp.float32)
    o_ref[...] = acc + b_ref[...]                               # f32 bias broadcast


def _fused_conv(w_kk, bias_col, x_flat, *, k, wp, tl):
    """out[b] = sum_{kh,kw} W_kk[kh,kw] @ shift(x_flat[b], kh*wp+kw) + bias."""
    B, cin, P = x_flat.shape
    kk, c_pad, _ = w_kk.shape

    # VMEM: double-buffered x/out blocks + resident weights/bias + live f32 row.
    vmem_need = (2 * (cin * P * 2 + c_pad * tl * 4)
                 + 2 * (kk * c_pad * cin * 4 + c_pad * 4)
                 + cin * P * 4 + c_pad * tl * 4)
    try:
        # Per-generation cap: v5e/v6e have 128 MiB physical VMEM, v7x only 64 MiB.
        vmem_cap = pltpu.get_tpu_info().vmem_capacity_bytes
    except Exception:
        vmem_cap = 64 << 20                                     # assume worst case (v7x)
    vmem_limit = int(min(max(4 * vmem_need, 8 << 20), (3 * vmem_cap) // 4))

    flops = 2 * B * kk * c_pad * cin * tl
    bytes_accessed = (B * cin * P * 2 + B * c_pad * tl * 4
                      + kk * c_pad * cin * 4 + c_pad * 4)

    return pl.pallas_call(
        functools.partial(_fused_conv_kernel, k=k, wp=wp),
        out_shape=jax.ShapeDtypeStruct((B, c_pad, tl), jnp.float32),
        grid=(B,),
        in_specs=[
            # Resident operands: constant index_map => DMA'd once, reused for all
            # batch steps.  (pl.Buffered(1) would single-buffer them; only worth
            # it on v7x when Cout*Cin*k*k is large.)
            pl.BlockSpec((kk, c_pad, cin), lambda b: (0, 0, 0)),
            pl.BlockSpec((c_pad, 1), lambda b: (0, 0)),
            # One padded activation row per batch element, streamed.
            pl.BlockSpec((None, cin, P), lambda b: (b, 0, 0)),
        ],
        out_specs=pl.BlockSpec((None, c_pad, tl), lambda b: (b, 0, 0)),
        compiler_params=pltpu.CompilerParams(
            dimension_semantics=("parallel",),      # batch axis -> megacore on v7x
            vmem_limit_bytes=vmem_limit,
        ),
        cost_estimate=pl.CostEstimate(
            flops=flops, transcendentals=0, bytes_accessed=bytes_accessed),
    )(w_kk, bias_col, x_flat)


# ------------------------------- JAX glue ------------------------------------

@functools.partial(jax.jit, static_argnames=("kernel_size", "padding"))
def sketched_conv_forward(x, u, w_s, bias, kernel_size, padding):
    B, cin, H, Wd = x.shape
    c_out = w_s.shape[0]
    k, p = kernel_size, padding
    # The module's result.view(B, Cout, H, W) implies a stride-1 "same" conv.
    assert H + 2 * p - k + 1 == H and Wd + 2 * p - k + 1 == Wd
    hp, wp = H + 2 * p, Wd + 2 * p

    # ---- fused weight (kept in f32: W_eff entries are sums over m terms) -----
    w_eff = jnp.dot(w_s.astype(jnp.float32), u.astype(jnp.float32))   # (Cout, Cin*k*k)
    w_eff = w_eff.reshape(c_out, cin, k, k)           # F.unfold order: (c, kh, kw)
    w_kk = jnp.transpose(w_eff, (2, 3, 0, 1)).reshape(k * k, c_out, cin)
    c_pad = _round_up(c_out, 8)                       # f32 out => 8-row granularity
    w_kk = jnp.pad(w_kk, ((0, 0), (0, c_pad - c_out), (0, 0)))
    bias_col = jnp.pad(bias.astype(jnp.float32), (0, c_pad - c_out)).reshape(c_pad, 1)

    # ---- activations: bf16, zero-padded spatially, row-flattened -------------
    tl = _round_up(H * wp, 128)                       # lane-dense output slab per batch
    P = _round_up(tl + (k - 1) * (wp + 1), 128)       # covers the largest tap offset
    xb = jnp.pad(x.astype(jnp.bfloat16), ((0, 0), (0, 0), (p, p), (p, p)))
    x_flat = xb.reshape(B, cin, hp * wp)
    x_flat = jnp.pad(x_flat, ((0, 0), (0, 0), (0, P - hp * wp)))

    out = _fused_conv(w_kk, bias_col, x_flat, k=k, wp=wp, tl=tl)      # (B, c_pad, tl)

    # Rows are laid out with stride wp: drop the channel padding, the 128-align
    # tail and the wp-W garbage columns per row (bias-only / wrapped values --
    # never consumed).
    out = out[:, :c_out, :H * wp].reshape(B, c_out, H, wp)[:, :, :, :Wd]
    return out                                                        # (B, Cout, H, W)


def unfold_nchw(x, k, pad):
    """F.unfold(x, kernel_size=k, padding=pad), stride=1, dilation=1 (reference)."""
    B, C, H, W = x.shape
    xp = jnp.pad(x, ((0, 0), (0, 0), (pad, pad), (pad, pad)))
    Ho = H + 2 * pad - k + 1
    Wo = W + 2 * pad - k + 1
    cols = []
    for i in range(k):
        for j in range(k):
            cols.append(xp[:, :, i:i + Ho, j:j + Wo])
    patches = jnp.stack(cols, axis=2)                 # (B, C, k*k, Ho, Wo)
    return patches.reshape(B, C * k * k, Ho * Wo)


def reference_forward(x, u, w_s, bias, kernel_size, padding):
    """Pure-JAX f32 reference with the module's original two-matmul order."""
    B, _, H, W = x.shape
    c_out = w_s.shape[0]
    x_unf = unfold_nchw(x, kernel_size, padding)                  # (B, n, L)
    sketch = jnp.einsum("mn,bnl->bml", u, x_unf)                  # (B, m, L)
    res = jnp.einsum("om,bml->bol", w_s, sketch)                  # (B, Cout, L)
    return res.reshape(B, c_out, H, W) + bias.reshape(1, c_out, 1, 1)


# ------------------------------ parameter setup ------------------------------

def build_params(key, in_channels, out_channels, kernel_size, m):
    n = in_channels * kernel_size * kernel_size
    k_w, k_b, k_u = jax.random.split(key, 3)
    W = jax.random.normal(k_w, (out_channels, in_channels, kernel_size, kernel_size),
                          dtype=jnp.float32) * 0.1
    bias = jax.random.normal(k_b, (out_channels,), dtype=jnp.float32) * 0.1
    # rademacher_mat(m, n): (+/-1) / sqrt(m)
    bern = jax.random.bernoulli(k_u, p=0.5, shape=(m, n)).astype(jnp.float32)
    U = (bern * 2.0 - 1.0) / jnp.sqrt(jnp.float32(m))
    # sketch_weight: W_s = W_flat @ U.T
    W_flat = W.reshape(out_channels, n)
    W_s = W_flat @ U.T                                            # (out_channels, m)
    return U, W_s, bias


# ---------------------------------- main --------------------------------------

if __name__ == "__main__":
    B, C_IN, H, W = 2, 4, 16, 16
    C_OUT = 8
    K = 3
    PAD = 1          # "same" padding so result.view(B, Cout, H, W) is valid
    M = 128          # sketch dimension (module default 1024; kept small)

    key = jax.random.PRNGKey(0)
    k_params, k_x = jax.random.split(key)

    U, W_s, bias = build_params(k_params, C_IN, C_OUT, K, M)
    x = jax.random.normal(k_x, (B, C_IN, H, W), dtype=jnp.float32)

    out = sketched_conv_forward(x, U, W_s, bias, kernel_size=K, padding=PAD)
    out = jax.block_until_ready(out)

    assert out.shape == (B, C_OUT, H, W), out.shape
    assert out.dtype == jnp.float32

    # Relative-error check against the f32 two-matmul reference (bf16 activations
    # + algebraic reassociation are the only precision differences).
    ref = jax.block_until_ready(reference_forward(x, U, W_s, bias, K, PAD))
    max_err = float(jnp.max(jnp.abs(out - ref)))
    scale = float(jnp.max(jnp.abs(ref))) + 1e-12
    rel_err = max_err / scale
    assert rel_err < 2e-2, f"relative error {rel_err} (abs {max_err})"

    print("KERNEL_OK")
</pallas_src>

<mosaic_0001>
module attributes {stable_mosaic.version = 11 : i64} {
  func.func @_fused_conv_kernel(%arg0: i32, %arg1: memref<9x8x4xf32, #tpu.memory_space<vmem>>, %arg2: memref<8x1xf32, #tpu.memory_space<vmem>>, %arg3: memref<1x4x512xbf16, #tpu.memory_space<vmem>>, %arg4: memref<1x8x384xf32, #tpu.memory_space<vmem>>) attributes {dimension_semantics = [#tpu.dimension_semantics<parallel>], iteration_bounds = array<i64: 2>, scalar_prefetch = 0 : i64, scratch_operands = 0 : i64, tpu.core_type = #tpu.core_type<tc>, window_params = [{pipeline_mode = #tpu.pipeline_mode<synchronous>, transform_indices = @transform_0, window_bounds = array<i64: 9, 8, 4>}, {pipeline_mode = #tpu.pipeline_mode<synchronous>, transform_indices = @transform_1, window_bounds = array<i64: 8, 1>}, {transform_indices = @transform_2, window_bounds = array<i64: 1, 4, 512>}, {transform_indices = @transform_3, window_bounds = array<i64: 1, 8, 384>}]} {
    %c0 = arith.constant 0 : index
    %c0_0 = arith.constant 0 : index
    %c0_1 = arith.constant 0 : index
    %0 = vector.load %arg3[%c0, %c0_0, %c0_1] : memref<1x4x512xbf16, #tpu.memory_space<vmem>>, vector<1x4x512xbf16>
    %1 = vector.shape_cast %0 : vector<1x4x512xbf16> to vector<4x512xbf16>
    %2 = arith.extf %1 : vector<4x512xbf16> to vector<4x512xf32>
    %cst = arith.constant 0.000000e+00 : f32
    %3 = vector.broadcast %cst : f32 to vector<8x384xf32>
    %4 = vector.extract_strided_slice %2 {offsets = [0, 0], sizes = [4, 384], strides = [1, 1]} : vector<4x512xf32> to vector<4x384xf32>
    %c0_2 = arith.constant 0 : index
    %c0_3 = arith.constant 0 : index
    %c0_4 = arith.constant 0 : index
    %5 = vector.load %arg1[%c0_2, %c0_3, %c0_4] : memref<9x8x4xf32, #tpu.memory_space<vmem>>, vector<1x8x4xf32>
    %6 = vector.shape_cast %5 : vector<1x8x4xf32> to vector<8x4xf32>
    %cst_5 = arith.constant dense<0.000000e+00> : vector<8x384xf32>
    %7 = tpu.matmul %6, %4, %cst_5 {dimension_numbers = #tpu.dot_dimension_numbers<[1], [0], [0], [1], [0, 0, 1, 1], [], []>} : vector<8x4xf32>, vector<4x384xf32>, vector<8x384xf32> -> vector<8x384xf32>
    %8 = arith.addf %3, %7 : vector<8x384xf32>
    %9 = vector.extract_strided_slice %2 {offsets = [0, 1], sizes = [4, 384], strides = [1, 1]} : vector<4x512xf32> to vector<4x384xf32>
    %c1 = arith.constant 1 : index
    %c0_6 = arith.constant 0 : index
    %c0_7 = arith.constant 0 : index
    %10 = vector.load %arg1[%c1, %c0_6, %c0_7] : memref<9x8x4xf32, #tpu.memory_space<vmem>>, vector<1x8x4xf32>
    %11 = vector.shape_cast %10 : vector<1x8x4xf32> to vector<8x4xf32>
    %cst_8 = arith.constant dense<0.000000e+00> : vector<8x384xf32>
    %12 = tpu.matmul %11, %9, %cst_8 {dimension_numbers = #tpu.dot_dimension_numbers<[1], [0], [0], [1], [0, 0, 1, 1], [], []>} : vector<8x4xf32>, vector<4x384xf32>, vector<8x384xf32> -> vector<8x384xf32>
    %13 = arith.addf %8, %12 : vector<8x384xf32>
    %14 = vector.extract_strided_slice %2 {offsets = [0, 2], sizes = [4, 384], strides = [1, 1]} : vector<4x512xf32> to vector<4x384xf32>
    %c2 = arith.constant 2 : index
    %c0_9 = arith.constant 0 : index
    %c0_10 = arith.constant 0 : index
    %15 = vector.load %arg1[%c2, %c0_9, %c0_10] : memref<9x8x4xf32, #tpu.memory_space<vmem>>, vector<1x8x4xf32>
    %16 = vector.shape_cast %15 : vector<1x8x4xf32> to vector<8x4xf32>
    %cst_11 = arith.constant dense<0.000000e+00> : vector<8x384xf32>
    %17 = tpu.matmul %16, %14, %cst_11 {dimension_numbers = #tpu.dot_dimension_numbers<[1], [0], [0], [1], [0, 0, 1, 1], [], []>} : vector<8x4xf32>, vector<4x384xf32>, vector<8x384xf32> -> vector<8x384xf32>
    %18 = arith.addf %13, %17 : vector<8x384xf32>
    %19 = vector.extract_strided_slice %2 {offsets = [0, 18], sizes = [4, 384], strides = [1, 1]} : vector<4x512xf32> to vector<4x384xf32>
    %c3 = arith.constant 3 : index
    %c0_12 = arith.constant 0 : index
    %c0_13 = arith.constant 0 : index
    %20 = vector.load %arg1[%c3, %c0_12, %c0_13] : memref<9x8x4xf32, #tpu.memory_space<vmem>>, vector<1x8x4xf32>
    %21 = vector.shape_cast %20 : vector<1x8x4xf32> to vector<8x4xf32>
    %cst_14 = arith.constant dense<0.000000e+00> : vector<8x384xf32>
    %22 = tpu.matmul %21, %19, %cst_14 {dimension_numbers = #tpu.dot_dimension_numbers<[1], [0], [0], [1], [0, 0, 1, 1], [], []>} : vector<8x4xf32>, vector<4x384xf32>, vector<8x384xf32> -> vector<8x384xf32>
    %23 = arith.addf %18, %22 : vector<8x384xf32>
    %24 = vector.extract_strided_slice %2 {offsets = [0, 19], sizes = [4, 384], strides = [1, 1]} : vector<4x512xf32> to vector<4x384xf32>
    %c4 = arith.constant 4 : index
    %c0_15 = arith.constant 0 : index
    %c0_16 = arith.constant 0 : index
    %25 = vector.load %arg1[%c4, %c0_15, %c0_16] : memref<9x8x4xf32, #tpu.memory_space<vmem>>, vector<1x8x4xf32>
    %26 = vector.shape_cast %25 : vector<1x8x4xf32> to vector<8x4xf32>
    %cst_17 = arith.constant dense<0.000000e+00> : vector<8x384xf32>
    %27 = tpu.matmul %26, %24, %cst_17 {dimension_numbers = #tpu.dot_dimension_numbers<[1], [0], [0], [1], [0, 0, 1, 1], [], []>} : vector<8x4xf32>, vector<4x384xf32>, vector<8x384xf32> -> vector<8x384xf32>
    %28 = arith.addf %23, %27 : vector<8x384xf32>
    %29 = vector.extract_strided_slice %2 {offsets = [0, 20], sizes = [4, 384], strides = [1, 1]} : vector<4x512xf32> to vector<4x384xf32>
    %c5 = arith.constant 5 : index
    %c0_18 = arith.constant 0 : index
    %c0_19 = arith.constant 0 : index
    %30 = vector.load %arg1[%c5, %c0_18, %c0_19] : memref<9x8x4xf32, #tpu.memory_space<vmem>>, vector<1x8x4xf32>
    %31 = vector.shape_cast %30 : vector<1x8x4xf32> to vector<8x4xf32>
    %cst_20 = arith.constant dense<0.000000e+00> : vector<8x384xf32>
    %32 = tpu.matmul %31, %29, %cst_20 {dimension_numbers = #tpu.dot_dimension_numbers<[1], [0], [0], [1], [0, 0, 1, 1], [], []>} : vector<8x4xf32>, vector<4x384xf32>, vector<8x384xf32> -> vector<8x384xf32>
    %33 = arith.addf %28, %32 : vector<8x384xf32>
    %34 = vector.extract_strided_slice %2 {offsets = [0, 36], sizes = [4, 384], strides = [1, 1]} : vector<4x512xf32> to vector<4x384xf32>
    %c6 = arith.constant 6 : index
    %c0_21 = arith.constant 0 : index
    %c0_22 = arith.constant 0 : index
    %35 = vector.load %arg1[%c6, %c0_21, %c0_22] : memref<9x8x4xf32, #tpu.memory_space<vmem>>, vector<1x8x4xf32>
    %36 = vector.shape_cast %35 : vector<1x8x4xf32> to vector<8x4xf32>
    %cst_23 = arith.constant dense<0.000000e+00> : vector<8x384xf32>
    %37 = tpu.matmul %36, %34, %cst_23 {dimension_numbers = #tpu.dot_dimension_numbers<[1], [0], [0], [1], [0, 0, 1, 1], [], []>} : vector<8x4xf32>, vector<4x384xf32>, vector<8x384xf32> -> vector<8x384xf32>
    %38 = arith.addf %33, %37 : vector<8x384xf32>
    %39 = vector.extract_strided_slice %2 {offsets = [0, 37], sizes = [4, 384], strides = [1, 1]} : vector<4x512xf32> to vector<4x384xf32>
    %c7 = arith.constant 7 : index
    %c0_24 = arith.constant 0 : index
    %c0_25 = arith.constant 0 : index
    %40 = vector.load %arg1[%c7, %c0_24, %c0_25] : memref<9x8x4xf32, #tpu.memory_space<vmem>>, vector<1x8x4xf32>
    %41 = vector.shape_cast %40 : vector<1x8x4xf32> to vector<8x4xf32>
    %cst_26 = arith.constant dense<0.000000e+00> : vector<8x384xf32>
    %42 = tpu.matmul %41, %39, %cst_26 {dimension_numbers = #tpu.dot_dimension_numbers<[1], [0], [0], [1], [0, 0, 1, 1], [], []>} : vector<8x4xf32>, vector<4x384xf32>, vector<8x384xf32> -> vector<8x384xf32>
    %43 = arith.addf %38, %42 : vector<8x384xf32>
    %44 = vector.extract_strided_slice %2 {offsets = [0, 38], sizes = [4, 384], strides = [1, 1]} : vector<4x512xf32> to vector<4x384xf32>
    %c8 = arith.constant 8 : index
    %c0_27 = arith.constant 0 : index
    %c0_28 = arith.constant 0 : index
    %45 = vector.load %arg1[%c8, %c0_27, %c0_28] : memref<9x8x4xf32, #tpu.memory_space<vmem>>, vector<1x8x4xf32>
    %46 = vector.shape_cast %45 : vector<1x8x4xf32> to vector<8x4xf32>
    %cst_29 = arith.constant dense<0.000000e+00> : vector<8x384xf32>
    %47 = tpu.matmul %46, %44, %cst_29 {dimension_numbers = #tpu.dot_dimension_numbers<[1], [0], [0], [1], [0, 0, 1, 1], [], []>} : vector<8x4xf32>, vector<4x384xf32>, vector<8x384xf32> -> vector<8x384xf32>
    %48 = arith.addf %43, %47 : vector<8x384xf32>
    %c0_30 = arith.constant 0 : index
    %c0_31 = arith.constant 0 : index
    %49 = vector.load %arg2[%c0_30, %c0_31] : memref<8x1xf32, #tpu.memory_space<vmem>>, vector<8x1xf32>
    %50 = vector.broadcast %49 : vector<8x1xf32> to vector<8x384xf32>
    %51 = arith.addf %48, %50 : vector<8x384xf32>
    %c0_32 = arith.constant 0 : index
    %c0_33 = arith.constant 0 : index
    %c0_34 = arith.constant 0 : index
    %52 = vector.load %arg4[%c0_32, %c0_33, %c0_34] : memref<1x8x384xf32, #tpu.memory_space<vmem>>, vector<1x8x384xf32>
    %53 = vector.shape_cast %52 : vector<1x8x384xf32> to vector<8x384xf32>
    %54 = vector.shape_cast %51 : vector<8x384xf32> to vector<1x8x384xf32>
    tpu.vector_store %arg4[%c0_32, %c0_33, %c0_34], %54 {strides = array<i32>} : memref<1x8x384xf32, #tpu.memory_space<vmem>>, vector<1x8x384xf32>,
    return
  }
  func.func @transform_0(%arg0: i32) -> (i32, i32, i32) {
    %c0_i32 = arith.constant 0 : i32
    %c0_i32_0 = arith.constant 0 : i32
    %c0_i32_1 = arith.constant 0 : i32
    %c0_i32_2 = arith.constant 0 : i32
    return %c0_i32, %c0_i32_0, %c0_i32_1 : i32, i32, i32
  }
  func.func @transform_1(%arg0: i32) -> (i32, i32) {
    %c0_i32 = arith.constant 0 : i32
    %c0_i32_0 = arith.constant 0 : i32
    %c0_i32_1 = arith.constant 0 : i32
    return %c0_i32, %c0_i32_0 : i32, i32
  }
  func.func @transform_2(%arg0: i32) -> (i32, i32, i32) {
    %c0_i32 = arith.constant 0 : i32
    %c0_i32_0 = arith.constant 0 : i32
    %c0_i32_1 = arith.constant 0 : i32
    return %arg0, %c0_i32, %c0_i32_0 : i32, i32, i32
  }
  func.func @transform_3(%arg0: i32) -> (i32, i32, i32) {
    %c0_i32 = arith.constant 0 : i32
    %c0_i32_0 = arith.constant 0 : i32
    %c0_i32_1 = arith.constant 0 : i32
    return %arg0, %c0_i32, %c0_i32_0 : i32, i32, i32
  }
}

</mosaic_0001>

<bundles_post_ra>
// kernel: sketched_conv_forward.1
= control target key start
LH: loop header
LB: loop body
LE: loop exit
PB: predicated region body
PF: predicated region fallthrough
CT: control target
= control target key end

     0   :  { %s1990_s12 = smov 0   ;;  %s2164_s0 = inlined_call_operand.vmem [shape: f32[9,8,4], index: 0, kind: input, shape index: {}]   ;;  %s2165_s1 = inlined_call_operand.vmem [shape: f32[8,1], index: 1, kind: input, shape index: {}]   ;;  %s2166_s2 = inlined_call_operand.vmem [shape: bf16[2,4,512], index: 2, kind: input, shape index: {}]   ;;  %s2167_s3 = inlined_call_operand.vmem [shape: f32[2,8,384], index: 3, kind: output, shape index: {}]  }
   0x1 LB: > { %s1731_s13 = sadd.s32 4294967295, %s1957_s12   ;;  %p1735_p0 = scmp.ge.s32.totalorder %s1957_s12, 1  ;;  %s1957_s12 = sphi %s1990_s12, %s13_s12  }
   0x2   : > { %p137_p1 = scmp.lt.s32.totalorder %s1957_s12, 3 }
   0x4   : > { %p138_p2 = pnand %p1735_p0, %p137_p1 }
   0x5   : > { %p161_p3 = scmp.lt.s32.totalorder (!%p138_p2), %s1731_s13, 1  ;;  %v1959_v0 = vmov (!%p138_p2), 0.0   ;;  %s1960_s18 = smov (!%p138_p2), 126   ;;  %vm1962_vm0 = vmmov (!%p138_p2), 0   ;;  %v1664_v9 = vld [vmem:[%s2165_s1] sm:$0xff] (!%p138_p2)  ;;  %v1969_v10 = vmov (!%p138_p2), 0  }
   0x6   : > { %141 = sbr.rel (%p138_p2) target bundleno = 424 (0x1a8), region = 32  ;;  %268 = vmatprep.mubr.f32.mxu0 (!%p138_p2), %v1959_v0  ;;  %1813 = vmatprep.subr.mxu1 (!%p138_p2), %v1959_v0  ;;  %s1961_s19 = smov (!%p138_p2), 127   ;;  %vm189_vm1 = vcmask (!%p138_p2), 1039360   ;;  %vm197_vm2 = vcmask (!%p138_p2), 1043456   ;;  %vm505_vm3 = vcmask (!%p138_p2), 1031168   ;;  %v1739_v20 = vld [vmem:[%s2164_s0 + $0x8] sm:$0xff] (!%p138_p2) }
   0x7   : > { %1815 = vmatprep.mubr.msk.f32.mxu1 (!%p138_p2), %vm1962_vm0, %v1959_v0  ;;  %s1963_s20 = smov (!%p138_p2), 110   ;;  %s1964_s21 = smov (!%p138_p2), 109   ;;  %1949 = vset.pattern.permute.xlu1 (!%p138_p2), %v1969_v10  ;;  %vm193_vm4 = vcmask (!%p138_p2), 31744   ;;  %v174_v29 = vld [vmem:[%s2164_s0] sm:$0xff] (!%p138_p2)  ;;  %vm672_vm5 = vcmask (!%p138_p2), 900096   ;;  %vm839_vm6 = vcmask (!%p138_p2), 891904  }
   0x8   : > { %s1965_s22 = smov (!%p138_p2), 108   ;;  %s1966_s23 = smov (!%p138_p2), 92   ;;  %1950 = vset.pattern.permute.xlu0 (!%p138_p2), %v1969_v10  ;;  %v1750_v39 = vld [vmem:[%s2164_s0 + $0x10] sm:$0xff] (!%p138_p2)  ;;  %v1756_v45 = vld [vmem:[%s2164_s0 + $0x18] sm:$0xff] (!%p138_p2)  ;;  %v1762_v51 = vld [vmem:[%s2164_s0 + $0x20] sm:$0xff] (!%p138_p2)  ;;  %vm1006_vm7 = vcmask (!%p138_p2), 883712  }
   0x9   : > { %s1967_s24 = smov (!%p138_p2), 91   ;;  %s1968_s25 = smov (!%p138_p2), 90   ;;  %vm1173_vm8 = vcmask (!%p138_p2), 752640   ;;  %v1768_v58 = vld [vmem:[%s2164_s0 + $0x28] sm:$0xff] (!%p138_p2)  ;;  %vm1340_vm9 = vcmask (!%p138_p2), 744448   ;;  %vm1507_vm10 = vcmask (!%p138_p2), 736256  }
   0xa   : > { %v1780_v10 = vld [vmem:[%s2164_s0 + $0x38] sm:$0xff] (!%p138_p2) }
   0xd   : > { %s2169_s13 = smov (!%p161_p3, %s1731_s13), 1 }
   0xe   : > { %s1794_s14 = sshll.u32 %s2169_s13, 3 }
   0xf   : > { %s165_s17 = scalar_lea.vmem %s2166_s2, %s1794_s14 }
  0x10   : > { %v171_v1 = vld [vmem:[%s165_s17] sm:$0xff] }
  0x11   : > { %v2006_v2 = vunpack.c.l.bf16 %v171_v1  ;;  %v2008_v3 = vunpack.c.h.bf16 %v171_v1 }
  0x13   : > { %v179_v4 = vcombine.high %v2006_v2, %v2006_v2  ;;  %v180_v6 = vcombine.high %v2008_v3, %v2008_v3 }
  0x15   : > { %v1899_v5 = vpack.i.bf16 %v2008_v3, %v179_v4  ;;  %v1924_v7 = vpack.i.bf16 %v180_v6, %v2006_v2  ;;  %v1944_v8 = vpack.i.bf16 %v2006_v2, %v180_v6 }
  0x17   : > { %1900 = vrot.lane.b32.xlu1 %v1899_v5, %s1960_s18  ;;  %1895 = vrot.lane.b32.xlu0 %v1899_v5, %s1961_s19 }
  0x1b   : > { %497 = vrot.lane.b32.xlu1 %v2006_v2, %s1960_s18  ;;  %181 = vrot.lane.b32.xlu0 %v2006_v2, %s1961_s19 }
  0x1f   : > { %664 = vrot.lane.b32.xlu1 %v2006_v2, %s1963_s20  ;;  %1905 = vrot.lane.b32.xlu0 %v1899_v5, %s1963_s20 }
  0x23   : > { %1910 = vrot.lane.b32.xlu1 %v1899_v5, %s1964_s21  ;;  %187 = vrot.lane.b32.xlu0 %v180_v6, %s1961_s19 }
  0x27   : > { %503 = vrot.lane.b32.xlu1 %v180_v6, %s1960_s18  ;;  %831 = vrot.lane.b32.xlu0 %v2006_v2, %s1964_s21 }
  0x2b   : > { %1915 = vrot.lane.b32.xlu0 %v1899_v5, %s1965_s22  ;;  %998 = vrot.lane.b32.xlu1 %v2006_v2, %s1965_s22 }
  0x2f   : > { %670 = vrot.lane.b32.xlu0 %v180_v6, %s1963_s20  ;;  %837 = vrot.lane.b32.xlu1 %v180_v6, %s1964_s21  ;;  %s1874_s21 = smul.u32 24, %s2169_s13 }
  0x33   : > { %1920 = vrot.lane.b32.xlu0 %v1899_v5, %s1966_s23  ;;  %1925 = vrot.lane.b32.xlu1 %v1924_v7, %s1966_s23 }
  0x37   : > { %1004 = vrot.lane.b32.xlu0 %v180_v6, %s1965_s22  ;;  %1930 = vrot.lane.b32.xlu1 %v1899_v5, %s1967_s24 }
  0x3b   : > { %1935 = vrot.lane.b32.xlu0 %v1924_v7, %s1967_s24  ;;  %1940 = vrot.lane.b32.xlu1 %v1899_v5, %s1968_s25  ;;  %s170_s24 = scalar_lea.vmem %s2167_s3, %s1874_s21 }
  0x3f   : > { %1945 = vrot.lane.b32.xlu0 %v1944_v8, %s1968_s25  ;;  %1667 = vperm.xlu1 %1949, %v1664_v9  }
  0x89   : > { %v1901_v11 = vpop.permute.xlu1 %1900  ;;  %v1896_v12 = vpop.permute.xlu0 %1895 }
  0x8a   : > { %v1898_v13 = vunpack.i.h.bf16 %v1896_v12  ;;  %v1897_v14 = vunpack.i.l.bf16 %v1896_v12  ;;  %v1903_v15 = vunpack.i.h.bf16 %v1901_v11  ;;  %v1902_v16 = vunpack.i.l.bf16 %v1901_v11 }
  0x8c   : > { %v191_v17 = vsel %vm189_vm1, %v1897_v14, %v1898_v13  ;;  %v507_v22 = vsel %vm505_vm3, %v1902_v16, %v1903_v15 }
  0x8d   : > { %v498_v18 = vpop.permute.xlu1 %497  ;;  %v182_v19 = vpop.permute.xlu0 %181  ;;  %1740 = vmatprep.subr.msk.mxu0 %vm197_vm2, %v191_v17 }
  0x8e   : > { %v190_v21 = vsel %vm189_vm1, %v182_v19, %v1897_v14  ;;  %v506_v30 = vsel %vm505_vm3, %v498_v18, %v1902_v16 }
  0x8f   : > { %1741 = vmatpush1.msk.msra.mxu0 %vm197_vm2, %v190_v21 }
  0x90   : > { %1742 = vmatmul.mubr.msk.f32.vlgmr.msra.gmra.mrb[0].mxu0 %vm193_vm4, %v1739_v20  ;;  %1745 = vmatprep.subr.msk.mxu0 %vm197_vm2, %v179_v4 }
  0x91   : > { %v665_v23 = vpop.permute.xlu1 %664  ;;  %v1906_v24 = vpop.permute.xlu0 %1905  ;;  %1746 = vmatpush1.msk.msra.mxu0 %vm197_vm2, %v2006_v2  ;;  %418 = vmatprep.mubr.f32.mxu0 %v1959_v0  ;;  %v1774_v2 = vld [vmem:[%s2164_s0 + $0x30] sm:$0xff] }
  0x92   : > { %1751 = vmatprep.subr.msk.mxu0 %vm197_vm2, %v507_v22  ;;  %v1908_v25 = vunpack.i.h.bf16 %v1906_v24  ;;  %v1907_v26 = vunpack.i.l.bf16 %v1906_v24 }
  0x94   : > { %v674_v34 = vsel %vm672_vm5, %v1907_v26, %v1908_v25  ;;  %v673_v41 = vsel %vm672_vm5, %v665_v23, %v1907_v26 }
  0x95   : > { %v1911_v27 = vpop.permute.xlu1 %1910  ;;  %v188_v28 = vpop.permute.xlu0 %187 }
  0x96   : > { %v192_v31 = vsel %vm189_vm1, %v1898_v13, %v188_v28  ;;  %v1913_v36 = vunpack.i.h.bf16 %v1911_v27  ;;  %v1912_v37 = vunpack.i.l.bf16 %v1911_v27 }
  0x97   : > { %1814 = vmatpush3.msk.msra.mxu1 %vm197_vm2, %v192_v31 }
  0x98   : > { %1816 = vmatmul.mubr.msk.f32.vlgmr.msra.gmra.mrb[0].mxu1 %vm193_vm4, %v1739_v20  ;;  %1747 = vmatmul.mubr.msk.f32.vlgmr.msra.gmra.mrb[0].mxu0 %vm193_vm4, %v174_v29  ;;  %v841_v42 = vsel %vm839_vm6, %v1912_v37, %v1913_v36 }
  0x99   : > { %1752 = vmatpush1.msk.msra.mxu0 %vm197_vm2, %v506_v30  ;;  %v504_v32 = vpop.permute.xlu1 %503  ;;  %v832_v33 = vpop.permute.xlu0 %831  ;;  %1818 = vmatprep.subr.mxu1 %v1959_v0 }
  0x9a   : > { %v508_v35 = vsel %vm505_vm3, %v1903_v15, %v504_v32  ;;  %1819 = vmatpush3.msk.msra.mxu1 %vm197_vm2, %v2008_v3  ;;  %1820 = vmatprep.mubr.msk.f32.mxu1 %vm1962_vm0, %v1959_v0  ;;  %v840_v53 = vsel %vm839_vm6, %v832_v33, %v1912_v37  ;;  %v1786_v15 = vld [vmem:[%s2164_s0 + $0x40] sm:$0xff] }
  0x9b   : > { %1823 = vmatprep.subr.mxu1 %v1959_v0  ;;  %582 = vmatprep.mubr.f32.mxu0 %v1959_v0 }
  0x9c   : > { %1821 = vmatmul.mubr.msk.f32.vlgmr.msra.gmra.mrb[2].mxu1 %vm193_vm4, %v174_v29  ;;  %1757 = vmatprep.subr.msk.mxu0 %vm197_vm2, %v674_v34 }
  0x9d   : > { %1824 = vmatpush3.msk.msra.mxu1 %vm197_vm2, %v508_v35  ;;  %v1916_v38 = vpop.permute.xlu0 %1915  ;;  %v999_v40 = vpop.permute.xlu1 %998  ;;  %1825 = vmatprep.mubr.msk.f32.mxu1 %vm1962_vm0, %v1959_v0 }
  0x9e   : > { %1828 = vmatprep.subr.mxu1 %v1959_v0  ;;  %v1917_v48 = vunpack.i.l.bf16 %v1916_v38  ;;  %v1918_v49 = vunpack.i.h.bf16 %v1916_v38 }
  0xa0   : > { %1753 = vmatmul.mubr.msk.f32.vlgmr.msra.gmra.mrb[0].mxu0 %vm193_vm4, %v1750_v39  ;;  %1826 = vmatmul.mubr.msk.f32.vlgmr.msra.gmra.mrb[4].mxu1 %vm193_vm4, %v1750_v39  ;;  %v1008_v56 = vsel %vm1006_vm7, %v1917_v48, %v1918_v49  ;;  %v1007_v4 = vsel %vm1006_vm7, %v999_v40, %v1917_v48 }
  0xa1   : > { %1758 = vmatpush1.msk.msra.mxu0 %vm197_vm2, %v673_v41  ;;  %v671_v43 = vpop.permute.xlu0 %670  ;;  %v838_v44 = vpop.permute.xlu1 %837  ;;  %749 = vmatprep.mubr.f32.mxu0 %v1959_v0 }
  0xa2   : > { %v675_v46 = vsel %vm672_vm5, %v1908_v25, %v671_v43  ;;  %v842_v47 = vsel %vm839_vm6, %v1913_v36, %v838_v44  ;;  %1830 = vmatprep.mubr.msk.f32.mxu1 %vm1962_vm0, %v1959_v0  ;;  %1763 = vmatprep.subr.msk.mxu0 %vm197_vm2, %v841_v42 }
  0xa3   : > { %1829 = vmatpush3.msk.msra.mxu1 %vm197_vm2, %v675_v46 }
  0xa4   : > { %1833 = vmatprep.subr.mxu1 %v1959_v0  ;;  %1831 = vmatmul.mubr.msk.f32.vlgmr.msra.gmra.mrb[6].mxu1 %vm193_vm4, %v1756_v45 }
  0xa5   : > { %1834 = vmatpush3.msk.msra.mxu1 %vm197_vm2, %v842_v47  ;;  %v1921_v50 = vpop.permute.xlu0 %1920  ;;  %1835 = vmatprep.mubr.msk.f32.mxu1 %vm1962_vm0, %v1959_v0  ;;  %v1926_v52 = vpop.permute.xlu1 %1925 }
  0xa6   : > { %v1923_v54 = vunpack.i.h.bf16 %v1921_v50  ;;  %1838 = vmatprep.subr.mxu1 %v1959_v0  ;;  %v1928_v55 = vunpack.i.h.bf16 %v1926_v52  ;;  %v1922_v62 = vunpack.i.l.bf16 %v1921_v50  ;;  %v1927_v11 = vunpack.i.l.bf16 %v1926_v52 }
  0xa8   : > { %1759 = vmatmul.mubr.msk.f32.vlgmr.msra.gmra.mrb[0].mxu0 %vm193_vm4, %v1756_v45  ;;  %1836 = vmatmul.mubr.msk.f32.vlgmr.msra.gmra.mrb[8].mxu1 %vm193_vm4, %v1762_v51  ;;  %v1176_v61 = vsel %vm1173_vm8, %v1923_v54, %v1928_v55  ;;  %v1175_v6 = vsel %vm1173_vm8, %v1922_v62, %v1923_v54  ;;  %v1174_v16 = vsel %vm1173_vm8, %v1927_v11, %v1922_v62 }
  0xa9   : > { %1764 = vmatpush1.msk.msra.mxu0 %vm197_vm2, %v840_v53  ;;  %v1005_v57 = vpop.permute.xlu0 %1004  ;;  %916 = vmatprep.mubr.f32.mxu0 %v1959_v0  ;;  %v1931_v59 = vpop.permute.xlu1 %1930 }
  0xaa   : > { %v1009_v60 = vsel %vm1006_vm7, %v1918_v49, %v1005_v57  ;;  %1769 = vmatprep.subr.msk.mxu0 %vm197_vm2, %v1008_v56  ;;  %1840 = vmatprep.mubr.msk.f32.mxu1 %vm1962_vm0, %v1959_v0  ;;  %v1933_v63 = vunpack.i.h.bf16 %v1931_v59  ;;  %v1932_v13 = vunpack.i.l.bf16 %v1931_v59 }
  0xab   : > { %1839 = vmatpush3.msk.msra.mxu1 %vm197_vm2, %v1009_v60 }
  0xac   : > { %1841 = vmatmul.mubr.msk.f32.vlgmr.msra.gmra.mrb[10].mxu1 %vm193_vm4, %v1768_v58  ;;  %1843 = vmatprep.subr.mxu1 %v1959_v0  ;;  %v1342_v17 = vsel %vm1340_vm9, %v1932_v13, %v1933_v63 }
  0xad   : > { %v1936_v1 = vpop.permute.xlu0 %1935  ;;  %1844 = vmatpush3.msk.msra.mxu1 %vm197_vm2, %v1176_v61  ;;  %1845 = vmatprep.mubr.msk.f32.mxu1 %vm1962_vm0, %v1959_v0  ;;  %v1941_v3 = vpop.permute.xlu1 %1940 }
  0xae   : > { %v1938_v5 = vunpack.i.h.bf16 %v1936_v1  ;;  %1848 = vmatprep.subr.mxu1 %v1959_v0  ;;  %v1943_v7 = vunpack.i.h.bf16 %v1941_v3  ;;  %v1937_v18 = vunpack.i.l.bf16 %v1936_v1  ;;  %v1942_v19 = vunpack.i.l.bf16 %v1941_v3 }
  0xb0   : > { %1765 = vmatmul.mubr.msk.f32.vlgmr.msra.gmra.mrb[0].mxu0 %vm193_vm4, %v1762_v51  ;;  %1846 = vmatmul.mubr.msk.f32.vlgmr.msra.gmra.mrb[12].mxu1 %vm193_vm4, %v1774_v2  ;;  %v1343_v8 = vsel %vm1340_vm9, %v1933_v63, %v1938_v5  ;;  %v1341_v20 = vsel %vm1340_vm9, %v1937_v18, %v1932_v13  ;;  %v1509_v21 = vsel %vm1507_vm10, %v1942_v19, %v1943_v7 }
  0xb1   : > { %1770 = vmatpush1.msk.msra.mxu0 %vm197_vm2, %v1007_v4  ;;  %1083 = vmatprep.mubr.f32.mxu0 %v1959_v0  ;;  %v1946_v9 = vpop.permute.xlu0 %1945 }
  0xb2   : > { %1775 = vmatprep.subr.msk.mxu0 %vm197_vm2, %v1175_v6  ;;  %v1947_v12 = vunpack.i.l.bf16 %v1946_v9  ;;  %1849 = vmatpush3.msk.msra.mxu1 %vm197_vm2, %v1343_v8  ;;  %v1948_v22 = vunpack.i.h.bf16 %v1946_v9 }
  0xb3   : > { %1850 = vmatprep.mubr.msk.f32.mxu1 %vm1962_vm0, %v1959_v0  ;;  %1853 = vmatprep.subr.mxu1 %v1959_v0 }
  0xb4   : > { %v1510_v14 = vsel %vm1507_vm10, %v1943_v7, %v1947_v12  ;;  %1851 = vmatmul.mubr.msk.f32.vlgmr.msra.gmra.mrb[14].mxu1 %vm193_vm4, %v1780_v10  ;;  %v1508_v23 = vsel %vm1507_vm10, %v1948_v22, %v1942_v19 }
  0xb5   : > { %1854 = vmatpush3.msk.msra.mxu1 %vm197_vm2, %v1510_v14  ;;  %1855 = vmatprep.mubr.msk.f32.mxu1 %vm1962_vm0, %v1959_v0 }
  0xb8   : > { %1771 = vmatmul.mubr.msk.f32.vlgmr.msra.gmra.mrb[0].mxu0 %vm193_vm4, %v1768_v58  ;;  %1856 = vmatmul.mubr.msk.f32.vlgmr.msra.gmra.mrb[16].mxu1 %vm193_vm4, %v1786_v15 }
  0xb9   : > { %1776 = vmatpush1.msk.msra.mxu0 %vm197_vm2, %v1174_v16  ;;  %1250 = vmatprep.mubr.f32.mxu0 %v1959_v0 }
  0xba   : > { %1781 = vmatprep.subr.msk.mxu0 %vm197_vm2, %v1342_v17 }
  0xbe   : > { %v1668_v47 = vpop.permute.xlu1 %1667 }
  0xc0   : > { %1777 = vmatmul.mubr.msk.f32.vlgmr.msra.gmra.mrb[0].mxu0 %vm193_vm4, %v1774_v2 }
  0xc1   : > { %1782 = vmatpush1.msk.msra.mxu0 %vm197_vm2, %v1341_v20  ;;  %1417 = vmatprep.mubr.f32.mxu0 %v1959_v0 }
  0xc2   : > { %1787 = vmatprep.subr.msk.mxu0 %vm197_vm2, %v1509_v21 }
  0xc8   : > { %1783 = vmatmul.mubr.msk.f32.vlgmr.msra.gmra.mrb[0].mxu0 %vm193_vm4, %v1780_v10 }
  0xc9   : > { %1788 = vmatpush1.msk.msra.mxu0 %vm197_vm2, %v1508_v23  ;;  %1584 = vmatprep.mubr.f32.mxu0 %v1959_v0 }
  0xd0   : > { %1789 = vmatmul.mubr.msk.f32.vlgmr.msra.gmra.mrb[0].mxu0 %vm193_vm4, %v1786_v15 }
 0x16b   : > { %v341_v24 = vpop.f32.mrb[0].mxu1 }
 0x16c   : > { %v1817_v25 = vpop.f32.mrb[1].mxu1 }
 0x16f   : > { %v491_v26 = vpop.f32.mrb[2].mxu1 }
 0x170   : > { %v492_v27 = vadd.f32 %v491_v26, %v341_v24  ;;  %v1822_v28 = vpop.f32.mrb[3].mxu1 }
 0x173   : > { %v655_v29 = vpop.f32.mrb[4].mxu1 }
 0x174   : > { %v661_v30 = vadd.f32 %v655_v29, %v492_v27  ;;  %v1827_v31 = vpop.f32.mrb[5].mxu1 }
 0x177   : > { %v822_v32 = vpop.f32.mrb[6].mxu1 }
 0x178   : > { %v828_v33 = vadd.f32 %v822_v32, %v661_v30  ;;  %v1832_v34 = vpop.f32.mrb[7].mxu1 }
 0x17b   : > { %v989_v35 = vpop.f32.mrb[8].mxu1 }
 0x17c   : > { %v995_v36 = vadd.f32 %v989_v35, %v828_v33  ;;  %v1837_v37 = vpop.f32.mrb[9].mxu1 }
 0x17f   : > { %v1156_v38 = vpop.f32.mrb[10].mxu1 }
 0x180   : > { %v1162_v39 = vadd.f32 %v1156_v38, %v995_v36  ;;  %v1842_v0 = vpop.f32.mrb[11].mxu1 }
 0x183   : > { %v1323_v40 = vpop.f32.mrb[12].mxu1 }
 0x184   : > { %v1329_v41 = vadd.f32 %v1323_v40, %v1162_v39  ;;  %v1847_v42 = vpop.f32.mrb[13].mxu1 }
 0x187   : > { %v1490_v43 = vpop.f32.mrb[14].mxu1 }
 0x188   : > { %v1496_v44 = vadd.f32 %v1490_v43, %v1329_v41  ;;  %v1852_v45 = vpop.f32.mrb[15].mxu1 }
 0x18b   : > { %v1657_v46 = vpop.f32.mrb[16].mxu1 }
 0x18c   : > { %v1663_v48 = vadd.f32 %v1657_v46, %v1496_v44  ;;  %v1857_v49 = vpop.f32.mrb[17].mxu1 }
 0x18e   : > { %v1672_v50 = vadd.f32 %v1668_v47, %v1663_v48 }
 0x190   : > { %1675 = vst [vmem:[%s170_s24 + $0x10] sm:$0xff] %v1672_v50 }
 0x1a3   : > { %v1586_v51 = vpop.f32.mrb[0].mxu0 }
 0x1a4   : > { %v1670_v52 = vadd.f32 %v1668_v47, %v1586_v51  ;;  %v1588_v53 = vpop.f32.mrb[1].mxu0 }
 0x1a5   : > { %v1671_v54 = vadd.f32 %v1668_v47, %v1588_v53 }
 0x1a6   : > { %1673 = vst [vmem:[%s170_s24] sm:$0xff] %v1670_v52 }
 0x1a7   : > { %1674 = vst [vmem:[%s170_s24 + $0x8] sm:$0xff] %v1671_v54 }
 0x1a8 PF: > { %s13_s12 = sadd.s32 1, %s1957_s12  }
 0x1a9   : > { %p10_p4 = scmp.ge.s32.totalorder %s13_s12, 4  }
 0x1ab   :  { %12 = sbr.rel (!%p10_p4) target bundleno = 1 (0x1), region = 70 }

</bundles_post_ra>
